<compile_context>
chip_gen: v6e
topology: v6e:2x2x1
jax: 0.10.0
libtpu: 0.0.40
codegen_flags: <defaults>
</compile_context>

<pallas_src>
import jax
import jax.numpy as jnp
from jax.experimental import pallas as pl
from jax.experimental.pallas import tpu as pltpu

_LANE = 128
_SUBLANE_BF16 = 16  # bf16 packs 16 rows per vreg sublane group


def _round_up(n, m):
    return ((n + m - 1) // m) * m


def _mlp_kernel(x_ref, w1_ref, b1_ref, w2_ref, b2_ref, o_ref, h_ref):
    # Hidden activation is computed once per batch tile (first n-step) and
    # cached in bf16 VMEM scratch so the n-tiled fc2 pass can reuse it.
    @pl.when(pl.program_id(1) == 0)
    def _():
        # fc1 on the MXU: bf16 operands (cast in-kernel), f32 accumulation.
        h = jnp.dot(x_ref[...].astype(jnp.bfloat16), w1_ref[...],
                    preferred_element_type=jnp.float32)
        # Bias + ReLU in f32 (safe on v5e's f32-only VPU).
        h = jnp.maximum(h + b1_ref[...], 0.0)
        h_ref[...] = h.astype(jnp.bfloat16)

    # fc2 for this output-column tile: bf16 operands, f32 accumulation.
    o = jnp.dot(h_ref[...], w2_ref[...], preferred_element_type=jnp.float32)
    o_ref[...] = o + b2_ref[...]


def prepare_params(w1, b1, w2, b2):
    """One-time weight prep (hoisted out of the forward): pad the hidden dim to
    a multiple of 128 and cast weights to bf16 / biases to f32 rows."""
    In, H = w1.shape
    assert w2.shape == (H, H) and b1.shape == (H,) and b2.shape == (H,)
    H_p = _round_up(H, _LANE)
    w1_p = jnp.pad(w1, ((0, 0), (0, H_p - H))).astype(jnp.bfloat16)
    w2_p = jnp.pad(w2, ((0, H_p - H), (0, H_p - H))).astype(jnp.bfloat16)
    b1_p = jnp.pad(b1, (0, H_p - H)).reshape(1, H_p).astype(jnp.float32)
    b2_p = jnp.pad(b2, (0, H_p - H)).reshape(1, H_p).astype(jnp.float32)
    return (w1_p, b1_p, w2_p, b2_p, H)


def neural_net_forward(x, params, *, batch_tile=256, n_tile_bytes=8 * 1024 * 1024):
    """x: (B, In) f32; params from prepare_params.  Returns (B, H) f32.

    batch_tile: rows per grid step (rounded to a multiple of 16).
    n_tile_bytes: max bytes of one streamed w2 column-tile (controls fc2
      N-tiling; keeps large-H cases inside v7x's 64 MiB VMEM).
    """
    w1_p, b1_p, w2_p, b2_p, H = params
    B, In = x.shape
    assert w1_p.shape[0] == In
    H_p = w1_p.shape[1]

    # --- batch tiling: multiple of 16, snug for small/ragged batches. ---
    tb = min(_round_up(batch_tile, _SUBLANE_BF16), _round_up(B, _SUBLANE_BF16))
    B_p = _round_up(B, tb)

    # --- fc2 output-column (N) tiling so w2 tiles stay VMEM-friendly. ---
    if H_p * H_p * 2 <= 2 * n_tile_bytes:
        tn = H_p                                    # w2 fully VMEM-resident
    else:
        tn = max(_LANE, (n_tile_bytes // (H_p * 2)) // _LANE * _LANE)
        while H_p % tn != 0:                        # tn must divide H_p
            tn -= _LANE
    n_steps = H_p // tn

    # Only pad the batch rows of x; keep f32, no feature padding, no HBM copy
    # of a bf16 x (cast happens in-kernel).
    x_p = x if B_p == B else jnp.pad(x, ((0, B_p - B), (0, 0)))

    # --- explicit VMEM budget (conservative: assume double-buffered weights). --
    est = (
        2 * (In * H_p * 2 + H_p * 4)          # w1 + b1
        + 2 * (H_p * tn * 2 + tn * 4)         # w2/b2 tile(s)
        + 2 * (tb * In * 4 + tb * tn * 4)     # x / out tiles (double-buffered)
        + tb * H_p * 2 + tb * H_p * 4         # h scratch (bf16) + f32 temp
    )
    try:
        phys_vmem = pltpu.get_tpu_info().vmem_capacity_bytes
    except Exception:  # pragma: no cover - conservative default (v7x per-TC)
        phys_vmem = 64 << 20
    vmem_limit = min(max(int(est * 1.5) + (2 << 20), 32 << 20),
                     int(phys_vmem * 0.8))

    w2_resident = n_steps == 1

    def build(single_buffer):
        def spec(shape, imap, resident):
            if single_buffer and resident:
                # Constant index_map => never re-fetched; single buffer halves
                # the resident-weight VMEM footprint.
                return pl.BlockSpec(shape, imap, pipeline_mode=pl.Buffered(1))
            return pl.BlockSpec(shape, imap)

        return pl.pallas_call(
            _mlp_kernel,
            out_shape=jax.ShapeDtypeStruct((B_p, H_p), jnp.float32),
            grid=(B_p // tb, n_steps),
            in_specs=[
                pl.BlockSpec((tb, In), lambda i, j: (i, 0)),   # x (f32, unpadded In)
                spec((In, H_p), lambda i, j: (0, 0), True),    # w1 resident
                spec((1, H_p), lambda i, j: (0, 0), True),     # b1 resident
                spec((H_p, tn), lambda i, j: (0, j), w2_resident),  # w2 (tiled)
                spec((1, tn), lambda i, j: (0, j), w2_resident),    # b2 (tiled)
            ],
            out_specs=pl.BlockSpec((tb, tn), lambda i, j: (i, j)),
            scratch_shapes=[pltpu.VMEM((tb, H_p), jnp.bfloat16)],  # cached hidden
            compiler_params=pltpu.CompilerParams(
                dimension_semantics=("parallel", "arbitrary"),
                vmem_limit_bytes=vmem_limit,
            ),
        )

    try:
        out_p = build(True)(x_p, w1_p, b1_p, w2_p, b2_p)
    except Exception:
        # Fallback if pipeline_mode / Buffered(1) is unsupported in this build.
        out_p = build(False)(x_p, w1_p, b1_p, w2_p, b2_p)

    out = out_p if B_p == B else out_p[:B]
    return out if H_p == H else out[:, :H]


def _ref(x, w1, b1, w2, b2):
    return jnp.maximum(x @ w1 + b1, 0.0) @ w2 + b2


if __name__ == "__main__":
    # Shapes consistent with the module: batch=8, input_size=32, hidden=32.
    # (output_size is unused in the PyTorch forward; fc2 maps hidden->hidden.)
    B, IN, HID = 8, 32, 32

    key = jax.random.PRNGKey(0)
    ks = jax.random.split(key, 8)
    x = jax.random.normal(ks[0], (B, IN), dtype=jnp.float32)
    lim1 = 1.0 / float(IN) ** 0.5
    lim2 = 1.0 / float(HID) ** 0.5
    w1 = jax.random.uniform(ks[1], (IN, HID), jnp.float32, -lim1, lim1)
    b1 = jax.random.uniform(ks[2], (HID,), jnp.float32, -lim1, lim1)
    w2 = jax.random.uniform(ks[3], (HID, HID), jnp.float32, -lim2, lim2)
    b2 = jax.random.uniform(ks[4], (HID,), jnp.float32, -lim2, lim2)

    # One-time weight prep (hoisted out of the per-call wrapper).
    params = prepare_params(w1, b1, w2, b2)

    # bf16 MXU operands with f32 accumulation -> loose-ish tolerance vs f32 ref
    # (documented precision choice).
    out = jax.block_until_ready(neural_net_forward(x, params))
    ref = _ref(x, w1, b1, w2, b2)
    assert out.shape == (B, HID)
    assert jnp.allclose(out, ref, atol=3e-2, rtol=3e-2), float(
        jnp.max(jnp.abs(out - ref)))

    # Ragged batch exercising a multi-step batch grid (tb=64 -> 4 grid steps,
    # padded rows sliced off) with the same prepared weights.
    B2 = 200
    x2 = jax.random.normal(ks[5], (B2, IN), dtype=jnp.float32)
    out2 = jax.block_until_ready(neural_net_forward(x2, params, batch_tile=64))
    ref2 = _ref(x2, w1, b1, w2, b2)
    assert out2.shape == (B2, HID)
    assert jnp.allclose(out2, ref2, atol=3e-2, rtol=3e-2), float(
        jnp.max(jnp.abs(out2 - ref2)))

    # Exercise the N-tiled fc2 path (hidden cached in VMEM scratch across
    # n-steps) by forcing a small w2 tile budget with hidden=256.
    HID3 = 256
    lim2b = 1.0 / float(HID3) ** 0.5
    w1b = jax.random.uniform(ks[6], (IN, HID3), jnp.float32, -lim1, lim1)
    b1b = jnp.zeros((HID3,), jnp.float32)
    w2b = jax.random.uniform(ks[7], (HID3, HID3), jnp.float32, -lim2b, lim2b)
    b2b = jnp.zeros((HID3,), jnp.float32)
    params_b = prepare_params(w1b, b1b, w2b, b2b)
    out3 = jax.block_until_ready(
        neural_net_forward(x, params_b, n_tile_bytes=32 * 1024))
    ref3 = _ref(x, w1b, b1b, w2b, b2b)
    assert out3.shape == (B, HID3)
    assert jnp.allclose(out3, ref3, atol=3e-2, rtol=3e-2), float(
        jnp.max(jnp.abs(out3 - ref3)))

    print("KERNEL_OK")
</pallas_src>

<mosaic_0001>
module attributes {stable_mosaic.version = 11 : i64} {
  func.func @_mlp_kernel(%arg0: i32, %arg1: i32, %arg2: memref<16x32xf32, #tpu.memory_space<vmem>>, %arg3: memref<32x128xbf16, #tpu.memory_space<vmem>>, %arg4: memref<1x128xf32, #tpu.memory_space<vmem>>, %arg5: memref<128x128xbf16, #tpu.memory_space<vmem>>, %arg6: memref<1x128xf32, #tpu.memory_space<vmem>>, %arg7: memref<16x128xf32, #tpu.memory_space<vmem>>, %arg8: memref<16x128xbf16, #tpu.memory_space<vmem>>) attributes {dimension_semantics = [#tpu.dimension_semantics<parallel>, #tpu.dimension_semantics<arbitrary>], iteration_bounds = array<i64: 1, 1>, scalar_prefetch = 0 : i64, scratch_operands = 1 : i64, tpu.core_type = #tpu.core_type<tc>, window_params = [{transform_indices = @transform_0, window_bounds = array<i64: 16, 32>}, {pipeline_mode = #tpu.pipeline_mode<synchronous>, transform_indices = @transform_1, window_bounds = array<i64: 32, 128>}, {pipeline_mode = #tpu.pipeline_mode<synchronous>, transform_indices = @transform_2, window_bounds = array<i64: 1, 128>}, {pipeline_mode = #tpu.pipeline_mode<synchronous>, transform_indices = @transform_3, window_bounds = array<i64: 128, 128>}, {pipeline_mode = #tpu.pipeline_mode<synchronous>, transform_indices = @transform_4, window_bounds = array<i64: 1, 128>}, {transform_indices = @transform_5, window_bounds = array<i64: 16, 128>}]} {
    %c0_i32 = arith.constant 0 : i32
    %0 = arith.cmpi eq, %arg1, %c0_i32 : i32
    %1 = arith.extui %0 : i1 to i32
    %c0_i32_0 = arith.constant 0 : i32
    %2 = arith.cmpi ne, %1, %c0_i32_0 : i32
    scf.if %2 {
      %c0_8 = arith.constant 0 : index
      %c0_9 = arith.constant 0 : index
      %10 = vector.load %arg2[%c0_8, %c0_9] : memref<16x32xf32, #tpu.memory_space<vmem>>, vector<16x32xf32>
      %11 = arith.truncf %10 : vector<16x32xf32> to vector<16x32xbf16>
      %c0_10 = arith.constant 0 : index
      %c0_11 = arith.constant 0 : index
      %12 = vector.load %arg3[%c0_10, %c0_11] : memref<32x128xbf16, #tpu.memory_space<vmem>>, vector<32x128xbf16>
      %cst_12 = arith.constant dense<0.000000e+00> : vector<16x128xf32>
      %13 = tpu.matmul %11, %12, %cst_12 {dimension_numbers = #tpu.dot_dimension_numbers<[1], [0], [0], [1], [0, 0, 1, 1], [], []>} : vector<16x32xbf16>, vector<32x128xbf16>, vector<16x128xf32> -> vector<16x128xf32>
      %c0_13 = arith.constant 0 : index
      %c0_14 = arith.constant 0 : index
      %14 = vector.load %arg4[%c0_13, %c0_14] : memref<1x128xf32, #tpu.memory_space<vmem>>, vector<1x128xf32>
      %15 = vector.broadcast %14 : vector<1x128xf32> to vector<16x128xf32>
      %16 = arith.addf %13, %15 : vector<16x128xf32>
      %cst_15 = arith.constant 0.000000e+00 : f32
      %17 = vector.broadcast %cst_15 : f32 to vector<16x128xf32>
      %18 = arith.maximumf %16, %17 : vector<16x128xf32>
      %19 = arith.truncf %18 : vector<16x128xf32> to vector<16x128xbf16>
      %c0_16 = arith.constant 0 : index
      %c0_17 = arith.constant 0 : index
      %20 = vector.load %arg8[%c0_16, %c0_17] : memref<16x128xbf16, #tpu.memory_space<vmem>>, vector<16x128xbf16>
      tpu.vector_store %arg8[%c0_16, %c0_17], %19 {strides = array<i32>} : memref<16x128xbf16, #tpu.memory_space<vmem>>, vector<16x128xbf16>,
    } else {
    }
    %c0 = arith.constant 0 : index
    %c0_1 = arith.constant 0 : index
    %3 = vector.load %arg8[%c0, %c0_1] : memref<16x128xbf16, #tpu.memory_space<vmem>>, vector<16x128xbf16>
    %c0_2 = arith.constant 0 : index
    %c0_3 = arith.constant 0 : index
    %4 = vector.load %arg5[%c0_2, %c0_3] : memref<128x128xbf16, #tpu.memory_space<vmem>>, vector<128x128xbf16>
    %cst = arith.constant dense<0.000000e+00> : vector<16x128xf32>
    %5 = tpu.matmul %3, %4, %cst {dimension_numbers = #tpu.dot_dimension_numbers<[1], [0], [0], [1], [0, 0, 1, 1], [], []>} : vector<16x128xbf16>, vector<128x128xbf16>, vector<16x128xf32> -> vector<16x128xf32>
    %c0_4 = arith.constant 0 : index
    %c0_5 = arith.constant 0 : index
    %6 = vector.load %arg6[%c0_4, %c0_5] : memref<1x128xf32, #tpu.memory_space<vmem>>, vector<1x128xf32>
    %7 = vector.broadcast %6 : vector<1x128xf32> to vector<16x128xf32>
    %8 = arith.addf %5, %7 : vector<16x128xf32>
    %c0_6 = arith.constant 0 : index
    %c0_7 = arith.constant 0 : index
    %9 = vector.load %arg7[%c0_6, %c0_7] : memref<16x128xf32, #tpu.memory_space<vmem>>, vector<16x128xf32>
    tpu.vector_store %arg7[%c0_6, %c0_7], %8 {strides = array<i32>} : memref<16x128xf32, #tpu.memory_space<vmem>>, vector<16x128xf32>,
    return
  }
  func.func @transform_0(%arg0: i32, %arg1: i32) -> (i32, i32) {
    %c0_i32 = arith.constant 0 : i32
    %c0_i32_0 = arith.constant 0 : i32
    return %arg0, %c0_i32 : i32, i32
  }
  func.func @transform_1(%arg0: i32, %arg1: i32) -> (i32, i32) {
    %c0_i32 = arith.constant 0 : i32
    %c0_i32_0 = arith.constant 0 : i32
    %c0_i32_1 = arith.constant 0 : i32
    return %c0_i32, %c0_i32_0 : i32, i32
  }
  func.func @transform_2(%arg0: i32, %arg1: i32) -> (i32, i32) {
    %c0_i32 = arith.constant 0 : i32
    %c0_i32_0 = arith.constant 0 : i32
    %c0_i32_1 = arith.constant 0 : i32
    return %c0_i32, %c0_i32_0 : i32, i32
  }
  func.func @transform_3(%arg0: i32, %arg1: i32) -> (i32, i32) {
    %c0_i32 = arith.constant 0 : i32
    %c0_i32_0 = arith.constant 0 : i32
    return %c0_i32, %arg1 : i32, i32
  }
  func.func @transform_4(%arg0: i32, %arg1: i32) -> (i32, i32) {
    %c0_i32 = arith.constant 0 : i32
    %c0_i32_0 = arith.constant 0 : i32
    return %c0_i32, %arg1 : i32, i32
  }
  func.func @transform_5(%arg0: i32, %arg1: i32) -> (i32, i32) {
    %c0_i32 = arith.constant 0 : i32
    return %arg0, %arg1 : i32, i32
  }
}

module attributes {stable_mosaic.version = 11 : i64} {
  func.func @_mlp_kernel(%arg0: i32, %arg1: i32, %arg2: memref<16x32xf32, #tpu.memory_space<vmem>>, %arg3: memref<32x128xbf16, #tpu.memory_space<vmem>>, %arg4: memref<1x128xf32, #tpu.memory_space<vmem>>, %arg5: memref<128x128xbf16, #tpu.memory_space<vmem>>, %arg6: memref<1x128xf32, #tpu.memory_space<vmem>>, %arg7: memref<16x128xf32, #tpu.memory_space<vmem>>, %arg8: memref<16x128xbf16, #tpu.memory_space<vmem>>) attributes {dimension_semantics = [#tpu.dimension_semantics<parallel>, #tpu.dimension_semantics<arbitrary>], iteration_bounds = array<i64: 1, 1>, scalar_prefetch = 0 : i64, scratch_operands = 1 : i64, tpu.core_type = #tpu.core_type<tc>, window_params = [{transform_indices = @transform_0, window_bounds = array<i64: 16, 32>}, {pipeline_mode = #tpu.pipeline_mode<synchronous>, transform_indices = @transform_1, window_bounds = array<i64: 32, 128>}, {pipeline_mode = #tpu.pipeline_mode<synchronous>, transform_indices = @transform_2, window_bounds = array<i64: 1, 128>}, {transform_indices = @transform_3, window_bounds = array<i64: 128, 128>}, {transform_indices = @transform_4, window_bounds = array<i64: 1, 128>}, {transform_indices = @transform_5, window_bounds = array<i64: 16, 128>}]} {
    %c0_i32 = arith.constant 0 : i32
    %0 = arith.cmpi eq, %arg1, %c0_i32 : i32
    %1 = arith.extui %0 : i1 to i32
    %c0_i32_0 = arith.constant 0 : i32
    %2 = arith.cmpi ne, %1, %c0_i32_0 : i32
    scf.if %2 {
      %c0_8 = arith.constant 0 : index
      %c0_9 = arith.constant 0 : index
      %10 = vector.load %arg2[%c0_8, %c0_9] : memref<16x32xf32, #tpu.memory_space<vmem>>, vector<16x32xf32>
      %11 = arith.truncf %10 : vector<16x32xf32> to vector<16x32xbf16>
      %c0_10 = arith.constant 0 : index
      %c0_11 = arith.constant 0 : index
      %12 = vector.load %arg3[%c0_10, %c0_11] : memref<32x128xbf16, #tpu.memory_space<vmem>>, vector<32x128xbf16>
      %cst_12 = arith.constant dense<0.000000e+00> : vector<16x128xf32>
      %13 = tpu.matmul %11, %12, %cst_12 {dimension_numbers = #tpu.dot_dimension_numbers<[1], [0], [0], [1], [0, 0, 1, 1], [], []>} : vector<16x32xbf16>, vector<32x128xbf16>, vector<16x128xf32> -> vector<16x128xf32>
      %c0_13 = arith.constant 0 : index
      %c0_14 = arith.constant 0 : index
      %14 = vector.load %arg4[%c0_13, %c0_14] : memref<1x128xf32, #tpu.memory_space<vmem>>, vector<1x128xf32>
      %15 = vector.broadcast %14 : vector<1x128xf32> to vector<16x128xf32>
      %16 = arith.addf %13, %15 : vector<16x128xf32>
      %cst_15 = arith.constant 0.000000e+00 : f32
      %17 = vector.broadcast %cst_15 : f32 to vector<16x128xf32>
      %18 = arith.maximumf %16, %17 : vector<16x128xf32>
      %19 = arith.truncf %18 : vector<16x128xf32> to vector<16x128xbf16>
      %c0_16 = arith.constant 0 : index
      %c0_17 = arith.constant 0 : index
      %20 = vector.load %arg8[%c0_16, %c0_17] : memref<16x128xbf16, #tpu.memory_space<vmem>>, vector<16x128xbf16>
      tpu.vector_store %arg8[%c0_16, %c0_17], %19 {strides = array<i32>} : memref<16x128xbf16, #tpu.memory_space<vmem>>, vector<16x128xbf16>,
    } else {
    }
    %c0 = arith.constant 0 : index
    %c0_1 = arith.constant 0 : index
    %3 = vector.load %arg8[%c0, %c0_1] : memref<16x128xbf16, #tpu.memory_space<vmem>>, vector<16x128xbf16>
    %c0_2 = arith.constant 0 : index
    %c0_3 = arith.constant 0 : index
    %4 = vector.load %arg5[%c0_2, %c0_3] : memref<128x128xbf16, #tpu.memory_space<vmem>>, vector<128x128xbf16>
    %cst = arith.constant dense<0.000000e+00> : vector<16x128xf32>
    %5 = tpu.matmul %3, %4, %cst {dimension_numbers = #tpu.dot_dimension_numbers<[1], [0], [0], [1], [0, 0, 1, 1], [], []>} : vector<16x128xbf16>, vector<128x128xbf16>, vector<16x128xf32> -> vector<16x128xf32>
    %c0_4 = arith.constant 0 : index
    %c0_5 = arith.constant 0 : index
    %6 = vector.load %arg6[%c0_4, %c0_5] : memref<1x128xf32, #tpu.memory_space<vmem>>, vector<1x128xf32>
    %7 = vector.broadcast %6 : vector<1x128xf32> to vector<16x128xf32>
    %8 = arith.addf %5, %7 : vector<16x128xf32>
    %c0_6 = arith.constant 0 : index
    %c0_7 = arith.constant 0 : index
    %9 = vector.load %arg7[%c0_6, %c0_7] : memref<16x128xf32, #tpu.memory_space<vmem>>, vector<16x128xf32>
    tpu.vector_store %arg7[%c0_6, %c0_7], %8 {strides = array<i32>} : memref<16x128xf32, #tpu.memory_space<vmem>>, vector<16x128xf32>,
    return
  }
  func.func @transform_0(%arg0: i32, %arg1: i32) -> (i32, i32) {
    %c0_i32 = arith.constant 0 : i32
    %c0_i32_0 = arith.constant 0 : i32
    return %arg0, %c0_i32 : i32, i32
  }
  func.func @transform_1(%arg0: i32, %arg1: i32) -> (i32, i32) {
    %c0_i32 = arith.constant 0 : i32
    %c0_i32_0 = arith.constant 0 : i32
    %c0_i32_1 = arith.constant 0 : i32
    return %c0_i32, %c0_i32_0 : i32, i32
  }
  func.func @transform_2(%arg0: i32, %arg1: i32) -> (i32, i32) {
    %c0_i32 = arith.constant 0 : i32
    %c0_i32_0 = arith.constant 0 : i32
    %c0_i32_1 = arith.constant 0 : i32
    return %c0_i32, %c0_i32_0 : i32, i32
  }
  func.func @transform_3(%arg0: i32, %arg1: i32) -> (i32, i32) {
    %c0_i32 = arith.constant 0 : i32
    %c0_i32_0 = arith.constant 0 : i32
    return %c0_i32, %arg1 : i32, i32
  }
  func.func @transform_4(%arg0: i32, %arg1: i32) -> (i32, i32) {
    %c0_i32 = arith.constant 0 : i32
    %c0_i32_0 = arith.constant 0 : i32
    return %c0_i32, %arg1 : i32, i32
  }
  func.func @transform_5(%arg0: i32, %arg1: i32) -> (i32, i32) {
    %c0_i32 = arith.constant 0 : i32
    return %arg0, %arg1 : i32, i32
  }
}

</mosaic_0001>

<bundles_post_ra>
// kernel: tpu_custom_call.1
= control target key start
LH: loop header
LB: loop body
LE: loop exit
PB: predicated region body
PF: predicated region fallthrough
CT: control target
= control target key end

     0   :  { %10 = vsyncpa [#allocation4], 0  ;;  %s524_s0 = inlined_call_operand.hbm [shape: f32[16,32], index: 0, kind: input, shape index: {}]   ;;  %s525_s1 = inlined_call_operand.hbm [shape: bf16[32,128], index: 1, kind: input, shape index: {}]   ;;  %s526_s2 = inlined_call_operand.vmem [shape: f32[1,128], index: 2, kind: input, shape index: {}]   ;;  %s527_s3 = inlined_call_operand.hbm [shape: bf16[128,128], index: 3, kind: input, shape index: {}]   ;;  %s528_s4 = inlined_call_operand.vmem [shape: f32[1,128], index: 4, kind: input, shape index: {}]   ;;  %s529_s5 = inlined_call_operand.hbm [shape: f32[16,128], index: 5, kind: output, shape index: {}]  }
   0x1   :  { %11 = vsyncpa [#allocation7], 0 }
   0x2   :  { %12 = vsyncpa [#allocation5], 0  ;;  %s460_s18 = smov [#allocation6]  }
   0x3   :  { %s30_s19 = sshll.u32 %s460_s18, 4  ;;  %s31_s19 = int_to_ptr.vmem [resolvable:$true] %s30_s19 }
   0x4   :  { %s382_s20 = scalar_lea.vmem %s31_s19, 256  ;;  %p387_p1 = scmp.lt.s32.totalorder %s31_s19, %s31_s19 }
   0x5   :  { %p383_p0 = scmp.ne.s32.totalorder %s31_s19, %s382_s20  ;;  %p388_p2 = scmp.lt.s32.totalorder %s382_s20, %s382_s20 }
   0x7   :  { %p389_p3 = por %p388_p2, %p387_p1 }
   0x9   :  { %p390_p4 = pnand %p389_p3, %p383_p0 }
   0xb   :  { %393 = shalt.err (!%p390_p4)
}
   0xc   :  { %s461_s21 = smov 64   ;;  %s462_s22 = smov 4  }
   0xd   :  { %36 = dma.hbm_to_vmem [thread:$0]  %s525_s1, 256, %s31_s19, [#allocation7], %s461_s21, %s461_s21, %s462_s22  }
   0xe   :  { %s463_s25 = smov [#allocation3]  }
   0xf   :  { %s18_s26 = sshll.u32 %s463_s25, 4  ;;  %s19_s26 = int_to_ptr.vmem [resolvable:$true] %s18_s26 }
  0x10   :  { %s402_s27 = scalar_lea.vmem %s19_s26, 256  ;;  %p407_p6 = scmp.lt.s32.totalorder %s19_s26, %s19_s26 }
  0x11   :  { %p403_p5 = scmp.ne.s32.totalorder %s19_s26, %s402_s27  ;;  %p408_p7 = scmp.lt.s32.totalorder %s402_s27, %s402_s27 }
  0x13   :  { %p409_p8 = por %p408_p7, %p407_p6 }
  0x15   :  { %p410_p9 = pnand %p409_p8, %p403_p5 }
  0x17   :  { %413 = shalt.err (!%p410_p9)
}
  0x18   :  { %s464_s28 = smov 128   ;;  %s465_s29 = smov 8  }
  0x19   :  { %24 = dma.hbm_to_vmem [thread:$0]  %s524_s0, 256, %s19_s26, [#allocation4], %s464_s28, %s464_s28, %s465_s29  }
  0x1a   :  { %s466_s1 = smov [#allocation8]  }
  0x1b   :  { %s44_s7 = sshll.u32 %s466_s1, 4  ;;  %s45_s7 = int_to_ptr.vmem [resolvable:$true] %s44_s7 }
  0x1c   :  { %s422_s8 = scalar_lea.vmem %s45_s7, 1024  ;;  %p427_p11 = scmp.lt.s32.totalorder %s45_s7, %s45_s7 }
  0x1d   :  { %p423_p10 = scmp.ne.s32.totalorder %s45_s7, %s422_s8  ;;  %p428_p12 = scmp.lt.s32.totalorder %s422_s8, %s422_s8 }
  0x1f   :  { %p429_p13 = por %p428_p12, %p427_p11 }
  0x21   :  { %p430_p0 = pnand %p429_p13, %p423_p10 }
  0x23   :  { %433 = shalt.err (!%p430_p0)
}
  0x24   :  { %50 = dma.hbm_to_vmem [thread:$0]  %s527_s3, 1024, %s45_s7, [#allocation7], %s461_s21, %s461_s21, %s462_s22  }
  0x25   :  { %454 = dma.done.wait [#allocation4], 256  }
  0x26   :  { %455 = vsyncadd [#allocation4], 4294967040 }
  0x27   :  { %456 = dma.done.wait [#allocation7], 1280  }
  0x28   :  { %457 = vsyncadd [#allocation7], 4294966016  ;;  %v467_v0 = vmov 0.0   ;;  %vm468_vm0 = vmmov 0   ;;  %v363_v1 = vld [vmem:[#allocation6 + $0x8] sm:$0xff]   ;;  %v364_v2 = vld [vmem:[#allocation6] sm:$0xff]  }
  0x29   :  { %325 = vmatprep.subr.bf16.mxu0 %v467_v0  ;;  %329 = vmatprep.mubr.msk.bf16.mxu0 %vm468_vm0, %v467_v0  ;;  %v67_v3 = vld [vmem:[#allocation3] sm:$0xff]  ;;  %v68_v4 = vld [vmem:[#allocation3 + $0x8] sm:$0xff]  ;;  %v365_v5 = vld [vmem:[#allocation8 + $0x38] sm:$0xff]   ;;  %vm93_vm1 = vcmask 261120  }
  0x2a   :  { %333 = vmatprep.subr.bf16.mxu1 %v467_v0  ;;  %349 = vmatprep.mubr.msk.bf16.mxu1 %vm468_vm0, %v467_v0  ;;  %v69_v6 = vpack.c.bf16 %v68_v4, %v67_v3  ;;  %v366_v7 = vld [vmem:[#allocation8 + $0x30] sm:$0xff]   ;;  %v367_v8 = vld [vmem:[#allocation8 + $0x28] sm:$0xff]   ;;  %v368_v9 = vld [vmem:[#allocation8 + $0x20] sm:$0xff]  }
  0x2b   :  { %326 = vmatpush3.bf16.msra.mxu0 %v363_v1  ;;  %334 = vmatpush3.bf16.msra.mxu1 %v365_v5  ;;  %v369_v10 = vld [vmem:[#allocation8 + $0x18] sm:$0xff]   ;;  %v370_v11 = vld [vmem:[#allocation8 + $0x10] sm:$0xff]   ;;  %v371_v12 = vld [vmem:[#allocation8 + $0x8] sm:$0xff]  }
  0x2c   :  { %327 = vmatprep.subr.bf16.mxu0 %v467_v0  ;;  %335 = vmatprep.subr.bf16.mxu1 %v467_v0  ;;  %v372_v13 = vld [vmem:[#allocation8] sm:$0xff]   ;;  %v290_v14 = vld [vmem:[%s526_s2] ss:$0 sm:$0xff]  ;;  %s469_s2 = smov [#allocation9]  }
  0x2d   :  { %v296_v25 = vld [vmem:[%s528_s4] ss:$0 sm:$0xff]  ;;  %s277_s13 = sshll.u32 %s469_s2, 4  ;;  %s278_s13 = int_to_ptr.vmem [resolvable:$true] %s277_s13 }
  0x2e   :  { %s434_s14 = scalar_lea.vmem %s278_s13, 256  ;;  %p439_p2 = scmp.lt.s32.totalorder %s278_s13, %s278_s13 }
  0x2f   :  { %328 = vmatpush3.bf16.msra.mxu0 %v364_v2  ;;  %336 = vmatpush3.bf16.msra.mxu1 %v366_v7  ;;  %p435_p1 = scmp.ne.s32.totalorder %s278_s13, %s434_s14  ;;  %p440_p3 = scmp.lt.s32.totalorder %s434_s14, %s434_s14 }
  0x30   :  { %337 = vmatprep.subr.bf16.mxu1 %v467_v0 }
  0x31   :  { %p441_p4 = por %p440_p3, %p439_p2 }
  0x32   :  { %330 = vmatmul.mubr.msk.bf16.vlgmr.msra.gmra.mxu0 %vm93_vm1, %v69_v6 }
  0x33   :  { %338 = vmatpush3.bf16.msra.mxu1 %v367_v8  ;;  %p442_p5 = pnand %p441_p4, %p435_p1 }
  0x34   :  { %339 = vmatprep.subr.bf16.mxu1 %v467_v0 }
  0x37   :  { %340 = vmatpush3.bf16.msra.mxu1 %v368_v9 }
  0x38   :  { %341 = vmatprep.subr.bf16.mxu1 %v467_v0 }
  0x3b   :  { %342 = vmatpush3.bf16.msra.mxu1 %v369_v10 }
  0x3c   :  { %343 = vmatprep.subr.bf16.mxu1 %v467_v0 }
  0x3f   :  { %344 = vmatpush3.bf16.msra.mxu1 %v370_v11 }
  0x40   :  { %345 = vmatprep.subr.bf16.mxu1 %v467_v0 }
  0x43   :  { %346 = vmatpush3.bf16.msra.mxu1 %v371_v12 }
  0x44   :  { %347 = vmatprep.subr.bf16.mxu1 %v467_v0 }
  0x47   :  { %348 = vmatpush3.bf16.msra.mxu1 %v372_v13 }
  0xf2   :  { %v131_v15 = vpop.f32.mrf.mxu0 }
  0xf3   :  { %v132_v17 = vadd.f32 %v290_v14, %v131_v15 }
  0xf4   :  { %v331_v16 = vpop.f32.mrf.mxu0 }
  0xf5   :  { %v138_v21 = vmax.f32 %v132_v17, 0.0 }
  0xf6   :  { %v134_v18 = vpop.f32.mrf.mxu0 }
  0xf7   :  { %v135_v19 = vadd.f32 %v290_v14, %v134_v18 }
  0xf8   :  { %v332_v20 = vpop.f32.mrf.mxu0 }
  0xf9   :  { %v139_v22 = vmax.f32 %v135_v19, 0.0 }
  0xfb   :  { %v311_v23 = vpack.c.bf16 %v139_v22, %v138_v21 }
  0xfd   :  { %312 = vst [vmem:[#allocation2] sm:$0xff] %v311_v23  }
 0x104   :  { %v373_v24 = vld [vmem:[#allocation2] sm:$0xff]  }
 0x105   :  { %350 = vmatmul.mubr.bf16.vlgmr.msra.gmra.mxu1 %v373_v24 }
 0x1c5   :  { %v263_v26 = vpop.f32.mrf.mxu1 }
 0x1c6   :  { %v264_v27 = vadd.f32 %v296_v25, %v263_v26 }
 0x1c7   :  { %v351_v28 = vpop.f32.mrf.mxu1 }
 0x1c8   :  { %270 = vst [vmem:[#allocation9] sm:$0xff] %v264_v27 }
 0x1c9   :  { %v266_v29 = vpop.f32.mrf.mxu1 }
 0x1ca   :  { %v267_v30 = vadd.f32 %v296_v25, %v266_v29 }
 0x1cb   :  { %v352_v31 = vpop.f32.mrf.mxu1 }
 0x1cc   :  { %271 = vst [vmem:[#allocation9 + $0x8] sm:$0xff] %v267_v30 }
 0x1cd   :  { %445 = shalt.err (!%p442_p5)
}
 0x1ce   :  { %283 = dma.vmem_to_hbm [thread:$0]  %s278_s13, 256, %s529_s5, [#allocation5], %s464_s28, %s464_s28, %s465_s29  }
 0x1cf   :  { %458 = dma.done.wait [#allocation5], 256  }
 0x1d0   :  { %459 = vsyncadd [#allocation5], 4294967040 }
 0x1d1   :  { %287 = vsyncpa [#allocation4], 1 }
 0x1d2   :  { %288 = vsyncpa [#allocation7], 1 }
 0x1d3   :  { %289 = vsyncpa [#allocation5], 1 }

// kernel: tpu_custom_call.1
= control target key start
LH: loop header
LB: loop body
LE: loop exit
PB: predicated region body
PF: predicated region fallthrough
CT: control target
= control target key end

     0   :  { %10 = vsyncpa [#allocation4], 0  ;;  %s524_s0 = inlined_call_operand.hbm [shape: f32[16,32], index: 0, kind: input, shape index: {}]   ;;  %s525_s1 = inlined_call_operand.hbm [shape: bf16[32,128], index: 1, kind: input, shape index: {}]   ;;  %s526_s2 = inlined_call_operand.vmem [shape: f32[1,128], index: 2, kind: input, shape index: {}]   ;;  %s527_s3 = inlined_call_operand.hbm [shape: bf16[128,128], index: 3, kind: input, shape index: {}]   ;;  %s528_s4 = inlined_call_operand.vmem [shape: f32[1,128], index: 4, kind: input, shape index: {}]   ;;  %s529_s5 = inlined_call_operand.hbm [shape: f32[16,128], index: 5, kind: output, shape index: {}]  }
   0x1   :  { %11 = vsyncpa [#allocation7], 0 }
   0x2   :  { %12 = vsyncpa [#allocation5], 0  ;;  %s460_s18 = smov [#allocation6]  }
   0x3   :  { %s30_s19 = sshll.u32 %s460_s18, 4  ;;  %s31_s19 = int_to_ptr.vmem [resolvable:$true] %s30_s19 }
   0x4   :  { %s382_s20 = scalar_lea.vmem %s31_s19, 256  ;;  %p387_p1 = scmp.lt.s32.totalorder %s31_s19, %s31_s19 }
   0x5   :  { %p383_p0 = scmp.ne.s32.totalorder %s31_s19, %s382_s20  ;;  %p388_p2 = scmp.lt.s32.totalorder %s382_s20, %s382_s20 }
   0x7   :  { %p389_p3 = por %p388_p2, %p387_p1 }
   0x9   :  { %p390_p4 = pnand %p389_p3, %p383_p0 }
   0xb   :  { %393 = shalt.err (!%p390_p4)
}
   0xc   :  { %s461_s21 = smov 64   ;;  %s462_s22 = smov 4  }
   0xd   :  { %36 = dma.hbm_to_vmem [thread:$0]  %s525_s1, 256, %s31_s19, [#allocation7], %s461_s21, %s461_s21, %s462_s22  }
   0xe   :  { %s463_s25 = smov [#allocation3]  }
   0xf   :  { %s18_s26 = sshll.u32 %s463_s25, 4  ;;  %s19_s26 = int_to_ptr.vmem [resolvable:$true] %s18_s26 }
  0x10   :  { %s402_s27 = scalar_lea.vmem %s19_s26, 256  ;;  %p407_p6 = scmp.lt.s32.totalorder %s19_s26, %s19_s26 }
  0x11   :  { %p403_p5 = scmp.ne.s32.totalorder %s19_s26, %s402_s27  ;;  %p408_p7 = scmp.lt.s32.totalorder %s402_s27, %s402_s27 }
  0x13   :  { %p409_p8 = por %p408_p7, %p407_p6 }
  0x15   :  { %p410_p9 = pnand %p409_p8, %p403_p5 }
  0x17   :  { %413 = shalt.err (!%p410_p9)
}
  0x18   :  { %s464_s28 = smov 128   ;;  %s465_s29 = smov 8  }
  0x19   :  { %24 = dma.hbm_to_vmem [thread:$0]  %s524_s0, 256, %s19_s26, [#allocation4], %s464_s28, %s464_s28, %s465_s29  }
  0x1a   :  { %s466_s1 = smov [#allocation8]  }
  0x1b   :  { %s44_s7 = sshll.u32 %s466_s1, 4  ;;  %s45_s7 = int_to_ptr.vmem [resolvable:$true] %s44_s7 }
  0x1c   :  { %s422_s8 = scalar_lea.vmem %s45_s7, 1024  ;;  %p427_p11 = scmp.lt.s32.totalorder %s45_s7, %s45_s7 }
  0x1d   :  { %p423_p10 = scmp.ne.s32.totalorder %s45_s7, %s422_s8  ;;  %p428_p12 = scmp.lt.s32.totalorder %s422_s8, %s422_s8 }
  0x1f   :  { %p429_p13 = por %p428_p12, %p427_p11 }
  0x21   :  { %p430_p0 = pnand %p429_p13, %p423_p10 }
  0x23   :  { %433 = shalt.err (!%p430_p0)
}
  0x24   :  { %50 = dma.hbm_to_vmem [thread:$0]  %s527_s3, 1024, %s45_s7, [#allocation7], %s461_s21, %s461_s21, %s462_s22  }
  0x25   :  { %454 = dma.done.wait [#allocation4], 256  }
  0x26   :  { %455 = vsyncadd [#allocation4], 4294967040 }
  0x27   :  { %456 = dma.done.wait [#allocation7], 1280  }
  0x28   :  { %457 = vsyncadd [#allocation7], 4294966016  ;;  %v467_v0 = vmov 0.0   ;;  %vm468_vm0 = vmmov 0   ;;  %v363_v1 = vld [vmem:[#allocation6 + $0x8] sm:$0xff]   ;;  %v364_v2 = vld [vmem:[#allocation6] sm:$0xff]  }
  0x29   :  { %325 = vmatprep.subr.bf16.mxu0 %v467_v0  ;;  %329 = vmatprep.mubr.msk.bf16.mxu0 %vm468_vm0, %v467_v0  ;;  %v67_v3 = vld [vmem:[#allocation3] sm:$0xff]  ;;  %v68_v4 = vld [vmem:[#allocation3 + $0x8] sm:$0xff]  ;;  %v365_v5 = vld [vmem:[#allocation8 + $0x38] sm:$0xff]   ;;  %vm93_vm1 = vcmask 261120  }
  0x2a   :  { %333 = vmatprep.subr.bf16.mxu1 %v467_v0  ;;  %349 = vmatprep.mubr.msk.bf16.mxu1 %vm468_vm0, %v467_v0  ;;  %v69_v6 = vpack.c.bf16 %v68_v4, %v67_v3  ;;  %v366_v7 = vld [vmem:[#allocation8 + $0x30] sm:$0xff]   ;;  %v367_v8 = vld [vmem:[#allocation8 + $0x28] sm:$0xff]   ;;  %v368_v9 = vld [vmem:[#allocation8 + $0x20] sm:$0xff]  }
  0x2b   :  { %326 = vmatpush3.bf16.msra.mxu0 %v363_v1  ;;  %334 = vmatpush3.bf16.msra.mxu1 %v365_v5  ;;  %v369_v10 = vld [vmem:[#allocation8 + $0x18] sm:$0xff]   ;;  %v370_v11 = vld [vmem:[#allocation8 + $0x10] sm:$0xff]   ;;  %v371_v12 = vld [vmem:[#allocation8 + $0x8] sm:$0xff]  }
  0x2c   :  { %327 = vmatprep.subr.bf16.mxu0 %v467_v0  ;;  %335 = vmatprep.subr.bf16.mxu1 %v467_v0  ;;  %v372_v13 = vld [vmem:[#allocation8] sm:$0xff]   ;;  %v290_v14 = vld [vmem:[%s526_s2] ss:$0 sm:$0xff]  ;;  %s469_s2 = smov [#allocation9]  }
  0x2d   :  { %v296_v25 = vld [vmem:[%s528_s4] ss:$0 sm:$0xff]  ;;  %s277_s13 = sshll.u32 %s469_s2, 4  ;;  %s278_s13 = int_to_ptr.vmem [resolvable:$true] %s277_s13 }
  0x2e   :  { %s434_s14 = scalar_lea.vmem %s278_s13, 256  ;;  %p439_p2 = scmp.lt.s32.totalorder %s278_s13, %s278_s13 }
  0x2f   :  { %328 = vmatpush3.bf16.msra.mxu0 %v364_v2  ;;  %336 = vmatpush3.bf16.msra.mxu1 %v366_v7  ;;  %p435_p1 = scmp.ne.s32.totalorder %s278_s13, %s434_s14  ;;  %p440_p3 = scmp.lt.s32.totalorder %s434_s14, %s434_s14 }
  0x30   :  { %337 = vmatprep.subr.bf16.mxu1 %v467_v0 }
  0x31   :  { %p441_p4 = por %p440_p3, %p439_p2 }
  0x32   :  { %330 = vmatmul.mubr.msk.bf16.vlgmr.msra.gmra.mxu0 %vm93_vm1, %v69_v6 }
  0x33   :  { %338 = vmatpush3.bf16.msra.mxu1 %v367_v8  ;;  %p442_p5 = pnand %p441_p4, %p435_p1 }
  0x34   :  { %339 = vmatprep.subr.bf16.mxu1 %v467_v0 }
  0x37   :  { %340 = vmatpush3.bf16.msra.mxu1 %v368_v9 }
  0x38   :  { %341 = vmatprep.subr.bf16.mxu1 %v467_v0 }
  0x3b   :  { %342 = vmatpush3.bf16.msra.mxu1 %v369_v10 }
  0x3c   :  { %343 = vmatprep.subr.bf16.mxu1 %v467_v0 }
  0x3f   :  { %344 = vmatpush3.bf16.msra.mxu1 %v370_v11 }
  0x40   :  { %345 = vmatprep.subr.bf16.mxu1 %v467_v0 }
  0x43   :  { %346 = vmatpush3.bf16.msra.mxu1 %v371_v12 }
  0x44   :  { %347 = vmatprep.subr.bf16.mxu1 %v467_v0 }
  0x47   :  { %348 = vmatpush3.bf16.msra.mxu1 %v372_v13 }
  0xf2   :  { %v131_v15 = vpop.f32.mrf.mxu0 }
  0xf3   :  { %v132_v17 = vadd.f32 %v290_v14, %v131_v15 }
  0xf4   :  { %v331_v16 = vpop.f32.mrf.mxu0 }
  0xf5   :  { %v138_v21 = vmax.f32 %v132_v17, 0.0 }
  0xf6   :  { %v134_v18 = vpop.f32.mrf.mxu0 }
  0xf7   :  { %v135_v19 = vadd.f32 %v290_v14, %v134_v18 }
  0xf8   :  { %v332_v20 = vpop.f32.mrf.mxu0 }
  0xf9   :  { %v139_v22 = vmax.f32 %v135_v19, 0.0 }
  0xfb   :  { %v311_v23 = vpack.c.bf16 %v139_v22, %v138_v21 }
  0xfd   :  { %312 = vst [vmem:[#allocation2] sm:$0xff] %v311_v23  }
 0x104   :  { %v373_v24 = vld [vmem:[#allocation2] sm:$0xff]  }
 0x105   :  { %350 = vmatmul.mubr.bf16.vlgmr.msra.gmra.mxu1 %v373_v24 }
 0x1c5   :  { %v263_v26 = vpop.f32.mrf.mxu1 }
 0x1c6   :  { %v264_v27 = vadd.f32 %v296_v25, %v263_v26 }
 0x1c7   :  { %v351_v28 = vpop.f32.mrf.mxu1 }
 0x1c8   :  { %270 = vst [vmem:[#allocation9] sm:$0xff] %v264_v27 }
 0x1c9   :  { %v266_v29 = vpop.f32.mrf.mxu1 }
 0x1ca   :  { %v267_v30 = vadd.f32 %v296_v25, %v266_v29 }
 0x1cb   :  { %v352_v31 = vpop.f32.mrf.mxu1 }
 0x1cc   :  { %271 = vst [vmem:[#allocation9 + $0x8] sm:$0xff] %v267_v30 }
 0x1cd   :  { %445 = shalt.err (!%p442_p5)
}
 0x1ce   :  { %283 = dma.vmem_to_hbm [thread:$0]  %s278_s13, 256, %s529_s5, [#allocation5], %s464_s28, %s464_s28, %s465_s29  }
 0x1cf   :  { %458 = dma.done.wait [#allocation5], 256  }
 0x1d0   :  { %459 = vsyncadd [#allocation5], 4294967040 }
 0x1d1   :  { %287 = vsyncpa [#allocation4], 1 }
 0x1d2   :  { %288 = vsyncpa [#allocation7], 1 }
 0x1d3   :  { %289 = vsyncpa [#allocation5], 1 }

</bundles_post_ra>
